<compile_context>
chip_gen: v7x
topology: tpu7x:2x2x1
jax: 0.10.0
libtpu: 0.0.40
codegen_flags: <defaults>
</compile_context>

<pallas_src>
import jax
import jax.numpy as jnp
from jax.experimental import pallas as pl
from jax.experimental.pallas import tpu as pltpu


def complex_model_kernel(x_ref, wf_ref, bf_ref, cw_ref, cb_ref, o_ref):
    # x_ref : (10, TB)   batch on lanes
    # wf_ref: (3, 10)    fused (layer2 @ layer1) weight
    # bf_ref: (3, 1)     fused bias (broadcast over lanes)
    # cw/cb : (1, 1)     SMEM scalars (1x1 conv weight / bias)
    y = jnp.dot(wf_ref[...], x_ref[...],
                preferred_element_type=jnp.float32) + bf_ref[...]
    y = jnp.maximum(y, 0.0)                       # ReLU (after both Linears)
    o_ref[...] = (y * cw_ref[0, 0] + cb_ref[0, 0]).astype(o_ref.dtype)


def _round_up(n, m):
    return ((n + m - 1) // m) * m


def complex_model_forward(x, params, max_tb=2048):
    """x: [B, 10] float32 -> [B, 1, 3, 1] float32 (NCHW), matching PyTorch."""
    w1, b1, w2, b2, cw, cb = params
    B = x.shape[0]

    # Host-side algebraic fusion of the two Linear layers (exact: no
    # nonlinearity between them).
    wf = (w1 @ w2).T                    # (3, 10)
    bf = (b1 @ w2 + b2).reshape(3, 1)   # (3, 1)
    cw_s = cw.reshape(1, 1)
    cb_s = cb.reshape(1, 1)

    # Adaptive lane tile: multiple of 128, single grid step for small B,
    # capped so large B streams through a bounded VMEM footprint.
    tb = min(max_tb, max(128, _round_up(B, 128)))
    n_tiles = pl.cdiv(B, tb)
    b_pad = n_tiles * tb

    # Transpose so batch is the lane axis; pad batch to a tile multiple.
    xt = x.T                            # (10, B)
    if b_pad != B:
        xt = jnp.pad(xt, ((0, 0), (0, b_pad - B)))

    out_t = pl.pallas_call(
        complex_model_kernel,
        out_shape=jax.ShapeDtypeStruct((3, b_pad), jnp.float32),
        grid=(n_tiles,),
        in_specs=[
            pl.BlockSpec((10, tb), lambda i: (0, i)),          # x tile (streamed)
            pl.BlockSpec((3, 10), lambda i: (0, 0)),           # fused weight (resident)
            pl.BlockSpec((3, 1), lambda i: (0, 0)),            # fused bias (resident)
            pl.BlockSpec((1, 1), lambda i: (0, 0),
                         memory_space=pltpu.SMEM),             # conv weight scalar
            pl.BlockSpec((1, 1), lambda i: (0, 0),
                         memory_space=pltpu.SMEM),             # conv bias scalar
        ],
        out_specs=pl.BlockSpec((3, tb), lambda i: (0, i)),
        compiler_params=pltpu.CompilerParams(
            dimension_semantics=("parallel",)),
    )(xt, wf, bf, cw_s, cb_s)

    out = out_t[:, :B].T                # (B, 3)
    # view(B, 1, 3, 1) — pure reshape to the NCHW output of the PyTorch module.
    return out.reshape(B, 1, 3, 1)


def init_params(key):
    """Deterministic parameter init matching the PyTorch module's shapes.

    PyTorch stores Linear weights as [out, in]; here they are stored
    transposed ([in, out]) so the reference does x @ W directly.
    """
    k1, k2, k3, k4, k5, k6 = jax.random.split(key, 6)
    w1 = jax.random.normal(k1, (10, 5), jnp.float32) * 0.3   # layer1.weight^T
    b1 = jax.random.normal(k2, (5,), jnp.float32) * 0.1      # layer1.bias
    w2 = jax.random.normal(k3, (5, 3), jnp.float32) * 0.3    # layer2[0].weight^T
    b2 = jax.random.normal(k4, (3,), jnp.float32) * 0.1      # layer2[0].bias
    cw = jax.random.normal(k5, (1,), jnp.float32)            # layer3.weight (1,1,1,1)
    cb = jax.random.normal(k6, (1,), jnp.float32) * 0.1      # layer3.bias
    return (w1, b1, w2, b2, cw, cb)


def reference_forward(x, params):
    """Pure-JAX reference of the PyTorch forward pass (unfused)."""
    w1, b1, w2, b2, cw, cb = params
    h = x @ w1 + b1
    h = jnp.maximum(h @ w2 + b2, 0.0)
    h = h.reshape(x.shape[0], 1, 3, 1)
    return h * cw[0] + cb[0]


if __name__ == "__main__":
    key = jax.random.PRNGKey(0)
    kp, kx = jax.random.split(key)
    params = init_params(kp)

    # B deliberately not a multiple of 128 to exercise the pad-and-slice
    # remainder path; adaptive tiling still runs this in a single grid step.
    B = 300
    x = jax.random.normal(kx, (B, 10), jnp.float32)

    y = complex_model_forward(x, params)
    y = jax.block_until_ready(y)

    y_ref = reference_forward(x, params)
    assert y.shape == (B, 1, 3, 1), y.shape
    assert jnp.allclose(y, y_ref, atol=1e-5, rtol=1e-5), "mismatch vs reference"

    print("KERNEL_OK")
</pallas_src>

<mosaic_0001>
module attributes {stable_mosaic.version = 11 : i64} {
  func.func @complex_model_kernel(%arg0: i32, %arg1: memref<10x384xf32, #tpu.memory_space<vmem>>, %arg2: memref<3x10xf32, #tpu.memory_space<vmem>>, %arg3: memref<3x1xf32, #tpu.memory_space<vmem>>, %arg4: memref<1x1xf32, #tpu.memory_space<smem>>, %arg5: memref<1x1xf32, #tpu.memory_space<smem>>, %arg6: memref<3x384xf32, #tpu.memory_space<vmem>>) attributes {dimension_semantics = [#tpu.dimension_semantics<parallel>], iteration_bounds = array<i64: 1>, scalar_prefetch = 0 : i64, scratch_operands = 0 : i64, tpu.core_type = #tpu.core_type<tc>, window_params = [{transform_indices = @transform_0, window_bounds = array<i64: 10, 384>}, {pipeline_mode = #tpu.pipeline_mode<synchronous>, transform_indices = @transform_1, window_bounds = array<i64: 3, 10>}, {pipeline_mode = #tpu.pipeline_mode<synchronous>, transform_indices = @transform_2, window_bounds = array<i64: 3, 1>}, {transform_indices = @transform_3, window_bounds = array<i64: 1, 1>}, {transform_indices = @transform_4, window_bounds = array<i64: 1, 1>}, {transform_indices = @transform_5, window_bounds = array<i64: 3, 384>}]} {
    %c0 = arith.constant 0 : index
    %c0_0 = arith.constant 0 : index
    %0 = vector.load %arg2[%c0, %c0_0] : memref<3x10xf32, #tpu.memory_space<vmem>>, vector<3x10xf32>
    %c0_1 = arith.constant 0 : index
    %c0_2 = arith.constant 0 : index
    %1 = vector.load %arg1[%c0_1, %c0_2] : memref<10x384xf32, #tpu.memory_space<vmem>>, vector<10x384xf32>
    %cst = arith.constant dense<0.000000e+00> : vector<3x384xf32>
    %2 = tpu.matmul %0, %1, %cst {dimension_numbers = #tpu.dot_dimension_numbers<[1], [0], [0], [1], [0, 0, 1, 1], [], []>} : vector<3x10xf32>, vector<10x384xf32>, vector<3x384xf32> -> vector<3x384xf32>
    %c0_3 = arith.constant 0 : index
    %c0_4 = arith.constant 0 : index
    %3 = vector.load %arg3[%c0_3, %c0_4] : memref<3x1xf32, #tpu.memory_space<vmem>>, vector<3x1xf32>
    %4 = vector.broadcast %3 : vector<3x1xf32> to vector<3x384xf32>
    %5 = arith.addf %2, %4 : vector<3x384xf32>
    %cst_5 = arith.constant 0.000000e+00 : f32
    %6 = vector.broadcast %cst_5 : f32 to vector<3x384xf32>
    %7 = arith.maximumf %5, %6 : vector<3x384xf32>
    %c0_6 = arith.constant 0 : index
    %c0_7 = arith.constant 0 : index
    %8 = memref.load %arg4[%c0_6, %c0_7] : memref<1x1xf32, #tpu.memory_space<smem>>
    %9 = vector.broadcast %8 : f32 to vector<3x384xf32>
    %10 = arith.mulf %7, %9 : vector<3x384xf32>
    %c0_8 = arith.constant 0 : index
    %c0_9 = arith.constant 0 : index
    %11 = memref.load %arg5[%c0_8, %c0_9] : memref<1x1xf32, #tpu.memory_space<smem>>
    %12 = vector.broadcast %11 : f32 to vector<3x384xf32>
    %13 = arith.addf %10, %12 : vector<3x384xf32>
    %c0_10 = arith.constant 0 : index
    %c0_11 = arith.constant 0 : index
    %14 = vector.load %arg6[%c0_10, %c0_11] : memref<3x384xf32, #tpu.memory_space<vmem>>, vector<3x384xf32>
    tpu.vector_store %arg6[%c0_10, %c0_11], %13 {strides = array<i32>} : memref<3x384xf32, #tpu.memory_space<vmem>>, vector<3x384xf32>,
    return
  }
  func.func @transform_0(%arg0: i32) -> (i32, i32) {
    %c0_i32 = arith.constant 0 : i32
    %c0_i32_0 = arith.constant 0 : i32
    return %c0_i32, %arg0 : i32, i32
  }
  func.func @transform_1(%arg0: i32) -> (i32, i32) {
    %c0_i32 = arith.constant 0 : i32
    %c0_i32_0 = arith.constant 0 : i32
    %c0_i32_1 = arith.constant 0 : i32
    return %c0_i32, %c0_i32_0 : i32, i32
  }
  func.func @transform_2(%arg0: i32) -> (i32, i32) {
    %c0_i32 = arith.constant 0 : i32
    %c0_i32_0 = arith.constant 0 : i32
    %c0_i32_1 = arith.constant 0 : i32
    return %c0_i32, %c0_i32_0 : i32, i32
  }
  func.func @transform_3(%arg0: i32) -> (i32, i32) {
    %c0_i32 = arith.constant 0 : i32
    %c0_i32_0 = arith.constant 0 : i32
    %c0_i32_1 = arith.constant 0 : i32
    return %c0_i32, %c0_i32_0 : i32, i32
  }
  func.func @transform_4(%arg0: i32) -> (i32, i32) {
    %c0_i32 = arith.constant 0 : i32
    %c0_i32_0 = arith.constant 0 : i32
    %c0_i32_1 = arith.constant 0 : i32
    return %c0_i32, %c0_i32_0 : i32, i32
  }
  func.func @transform_5(%arg0: i32) -> (i32, i32) {
    %c0_i32 = arith.constant 0 : i32
    %c0_i32_0 = arith.constant 0 : i32
    return %c0_i32, %arg0 : i32, i32
  }
}

</mosaic_0001>

<bundles_post_ra>
// kernel: tpu_custom_call.1
= control target key start
LH: loop header
LB: loop body
LE: loop exit
PB: predicated region body
PF: predicated region fallthrough
CT: control target
= control target key end

     0   :  { %12 = vsyncpa [#allocation5], 0  ;;  %s397_s0 = inlined_call_operand.hbm [shape: f32[10,384], index: 0, kind: input, shape index: {}]   ;;  %s398_s1 = inlined_call_operand.vmem [shape: f32[3,10], index: 1, kind: input, shape index: {}]   ;;  %s399_s2 = inlined_call_operand.vmem [shape: f32[3,1], index: 2, kind: input, shape index: {}]   ;;  %s400_s3 = inlined_call_operand.<no memory space> [shape: f32[1,1], index: 3, kind: input, shape index: {}]   ;;  %s401_s4 = inlined_call_operand.<no memory space> [shape: f32[1,1], index: 4, kind: input, shape index: {}]   ;;  %s402_s5 = inlined_call_operand.hbm [shape: f32[3,384], index: 5, kind: output, shape index: {}]  }
   0x1   :  { %13 = vsyncpa [#allocation6], 0  ;;  %s322_s18 = smov [#allocation4]   ;;  %s274_s22 = scalar_lea.hbm %s397_s0, 768 }
   0x2   :  { %s19_s19 = sshll.u32 %s322_s18, 4  ;;  %p275_p0 = scmp.ne.s32.totalorder %s397_s0, %s274_s22  ;;  %s20_s19 = int_to_ptr.vmem [resolvable:$true] %s19_s19 }
   0x3   :  { %p278_p1 = scmp.lt.u32.totalorder %s274_s22, %s397_s0 }
   0x5   :  { %p280_p2 = pnand %p278_p1, %p275_p0 }
   0x7   :  { %283 = shalt.err (!%p280_p2)
}
   0x8   :  { %s284_s27 = scalar_lea.vmem %s20_s19, 768  ;;  %p289_p4 = scmp.lt.s32.totalorder %s20_s19, %s20_s19 }
   0x9   :  { %p285_p3 = scmp.ne.s32.totalorder %s20_s19, %s284_s27  ;;  %p290_p5 = scmp.lt.s32.totalorder %s284_s27, %s284_s27 }
   0xb   :  { %p291_p6 = por %p290_p5, %p289_p4 }
   0xd   :  { %p292_p7 = pnand %p291_p6, %p285_p3 }
   0xf   :  { %295 = shalt.err (!%p292_p7)
}
  0x10   :  { %s323_s28 = smov 384   ;;  %s324_s29 = smov 24  }
  0x11   :  { %25 = dma.hbm_to_vmem [thread:$0]  %s397_s0, 768, %s20_s19, [#allocation5], %s323_s28, %s323_s28, %s324_s29  }
  0x12   :  { %318 = dma.done.wait [#allocation5], 768  }
  0x13   :  { %319 = vsyncadd [#allocation5], 4294966528  ;;  %v325_v0 = vmov 0.0|0.0   ;;  %v326_v1 = vmov 0.0   ;;  %vm327_vm0 = vmmov 0   ;;  %v328_v2 = vmov 0  }
  0x14   :  { %260 = vmatprep.subr.bf16.mxu1 %v325_v0  ;;  %128 = vmatprep.mubr.f32.mxu0 %v326_v1  ;;  %vm54_vm1 = vcmask 1041408   ;;  %vm329_vm2 = vmmov 1   ;;  %v39_v3 = vld [vmem:[#allocation4 + $0x8] sm:$0xff]  ;;  %v42_v4 = vld [vmem:[#allocation4 + $0x20] sm:$0x3]  ;;  %v40_v8 = vld [vmem:[#allocation4 + $0x10] sm:$0xff]  ;;  %v209_v21 = vstv %s400_s3  ;;  %v214_v25 = vstv %s401_s4 }
  0x15   :  { %251 = vmatprep.mubr.msk.f32.mxu1 %vm327_vm0, %v326_v1  ;;  %273 = vset.pattern.permute.xlu0 %v328_v2  ;;  %vm255_vm3 = vmpackc.low %vm54_vm1, %vm329_vm2  ;;  %v38_v5 = vld [vmem:[#allocation4] sm:$0xff]  ;;  %v254_v6 = vpack.c.bf16 %v42_v4, %v39_v3  ;;  %v41_v7 = vld [vmem:[#allocation4 + $0x18] sm:$0x3]  ;;  %vm50_vm4 = vcmask 80896  }
  0x16   :  { %v43_v9 = vld [vmem:[#allocation4 + $0x28] sm:$0x3]  ;;  %v257_v10 = vpack.c.bf16 %v41_v7, %v38_v5  ;;  %v44_v12 = vld [vmem:[%s399_s2] sm:$0x7] }
  0x17   :  { %v261_v11 = vpack.c.bf16 %v43_v9, %v40_v8  ;;  %256 = vmatprep.subr.msk.bf16.mxu0 %vm255_vm3, %v254_v6  ;;  %47 = vperm.xlu0 %273, %v44_v12   ;;  %v37_v13 = vld [vmem:[%s398_s1] sm:$0x7]  ;;  %s330_s1 = smov [#allocation7]  }
  0x18   :  { %259 = vmatpush1.bf16.msk.msra.mxu0 %vm255_vm3, %v257_v10  ;;  %s230_s13 = sshll.u32 %s330_s1, 4  ;;  %s231_s13 = int_to_ptr.vmem [resolvable:$true] %s230_s13 }
  0x19   :  { %263 = vmatpush3.bf16.msk.msra.mxu1 %vm255_vm3, %v261_v11  ;;  %s296_s3 = scalar_lea.vmem %s231_s13, 192  ;;  %p301_p9 = scmp.lt.s32.totalorder %s231_s13, %s231_s13 }
  0x1a   :  { %p297_p8 = scmp.ne.s32.totalorder %s231_s13, %s296_s3  ;;  %p302_p10 = scmp.lt.s32.totalorder %s296_s3, %s296_s3 }
  0x1b   :  { %241 = vmatmul.mubr.msk.f32.vlgmr.msra.gmra.mrb[0].mxu0 %vm50_vm4, %v37_v13 }
  0x1c   :  { %252 = vmatmul.mubr.msk.f32.vlgmr.msra.gmra.mrb[0].mxu1 %vm50_vm4, %v37_v13  ;;  %p303_p11 = por %p302_p10, %p301_p9 }
  0x1e   :  { %p304_p12 = pnand %p303_p11, %p297_p8 }
  0x96   :  { %v48_v14 = vpop.permute.xlu0 %47 }
  0xee   :  { %v130_v15 = vpop.f32.mrb[0].mxu0 }
  0xef   :  { %v201_v16 = vpop.f32.mrb[0].mxu1  ;;  %v131_v17 = vadd.f32 %v130_v15, %v48_v14  ;;  %v132_v18 = vpop.f32.mrb[1].mxu0 }
  0xf0   :  { %v202_v19 = vadd.f32 %v201_v16, %v48_v14  ;;  %v253_v20 = vpop.f32.mrb[1].mxu1  ;;  %v133_v22 = vadd.f32 %v132_v18, %v48_v14 }
  0xf1   :  { %v205_v23 = vmax.f32 %v131_v17, 0.0 }
  0xf2   :  { %v207_v24 = vmax.f32 %v202_v19, 0.0  ;;  %v206_v26 = vmax.f32 %v133_v22, 0.0 }
  0xf3   :  { %v210_v27 = vmul.f32 %v209_v21, %v205_v23 }
  0xf4   :  { %v212_v28 = vmul.f32 %v209_v21, %v207_v24  ;;  %v211_v29 = vmul.f32 %v209_v21, %v206_v26 }
  0xf5   :  { %v215_v30 = vadd.f32 %v214_v25, %v210_v27 }
  0xf6   :  { %v217_v31 = vadd.f32 %v214_v25, %v212_v28  ;;  %v216_v32 = vadd.f32 %v214_v25, %v211_v29 }
  0xf8   :  { %223 = vst [vmem:[#allocation7 + $0x8] sm:$0x7] %v217_v31  ;;  %v220_v33 = vcombine.low %v215_v30, %v216_v32 }
  0xfa   :  { %222 = vst [vmem:[#allocation7] sm:$0x77] %v220_v33 }
  0xfb   :  { %307 = shalt.err (!%p304_p12)
}
  0xfc   :  { %s308_s15 = scalar_lea.hbm %s402_s5, 192 }
  0xfd   :  { %p309_p13 = scmp.ne.s32.totalorder %s402_s5, %s308_s15  ;;  %p312_p0 = scmp.lt.u32.totalorder %s308_s15, %s402_s5 }
  0xff   :  { %p314_p1 = pnand %p312_p0, %p309_p13 }
 0x101   :  { %317 = shalt.err (!%p314_p1)
}
 0x102   :  { %233 = dma.vmem_to_hbm [thread:$0]  %s231_s13, 192, %s402_s5, [#allocation6]  }
 0x103   :  { %320 = dma.done.wait [#allocation6], 192  }
 0x104   :  { %321 = vsyncadd [#allocation6], 4294967104 }
 0x105   :  { %237 = vsyncpa [#allocation5], 1 }
 0x106   :  { %238 = vsyncpa [#allocation6], 1 }

</bundles_post_ra>
